<compile_context>
chip_gen: v7x
topology: tpu7x:2x2x1
jax: 0.10.0
libtpu: 0.0.40
codegen_flags: <defaults>
</compile_context>

<pallas_src>
import functools

import jax
import jax.numpy as jnp
from jax.experimental import pallas as pl
from jax.experimental.pallas import tpu as pltpu


# ----------------------------------------------------------------------------
# Kernels
# ----------------------------------------------------------------------------
def _conv_stats_kernel(x_ref, w_ref, b_ref, y_ref, s_ref, q_ref,
                       *, ksize, stride, dilation, l_out):
    """Dilated Conv1d + bias for one batch element, plus per-channel partial
    sum / sum-of-squares accumulated across the batch grid axis.

      x_ref : (1, C_in, L_pad)  bf16   (zero padded along L)
      w_ref : (K, C_out, C_in)  bf16
      b_ref : (C_out, 1)        f32
      y_ref : (1, C_out, L_out) f32    pre-BN conv output
      s_ref : (C_out, 1)        f32    running sum   (resident across the grid)
      q_ref : (C_out, 1)        f32    running sumsq (resident across the grid)
    """
    i = pl.program_id(0)

    @pl.when(i == 0)
    def _():
        s_ref[...] = jnp.zeros_like(s_ref)
        q_ref[...] = jnp.zeros_like(q_ref)

    xv = x_ref[0]                                    # (C_in, L_pad)
    c_in = xv.shape[0]
    c_out = w_ref.shape[1]

    # One lane-dense matmul per tap, f32 accumulation on the MXU.
    # TODO(synk): folding the K taps into a single (C_out, K*C_in) contraction is
    # a further v6e/v7x win when C_in is very small.
    acc = jnp.zeros((c_out, l_out), jnp.float32)
    for j in range(ksize):
        start = j * dilation
        if stride == 1:
            tap = jax.lax.slice_in_dim(xv, start, start + l_out, axis=1)
        else:
            # TODO(synk): stride>1 uses a strided lane slice (relayout); hoist a
            # phase-split to the wrapper if strided TCNs ever matter.
            tap = jax.lax.slice(xv, (0, start),
                                (c_in, start + stride * (l_out - 1) + 1),
                                (1, stride))
        acc = acc + jnp.dot(w_ref[j], tap, preferred_element_type=jnp.float32)

    y = acc + b_ref[...]                             # (C_out, L_out) f32
    y_ref[0] = y
    s_ref[...] += jnp.sum(y, axis=1, keepdims=True)
    q_ref[...] += jnp.sum(y * y, axis=1, keepdims=True)


def _bn_scale_shift(s_ref, q_ref, g_ref, be_ref, count, eps):
    """Per-channel BN affine (scale, shift) from running sum / sumsq (f32)."""
    inv_count = 1.0 / count
    mean = s_ref[...] * inv_count                    # (C, 1)
    var = q_ref[...] * inv_count - mean * mean       # biased variance, f32
    scale = g_ref[...] * jax.lax.rsqrt(var + eps)
    shift = be_ref[...] - mean * scale
    return scale, shift


def _bn_relu_kernel(y_ref, s_ref, q_ref, g_ref, be_ref, o_ref, *, count, eps):
    """BatchNorm (batch stats) + ReLU on one (1, C, L_tile) block."""
    scale, shift = _bn_scale_shift(s_ref, q_ref, g_ref, be_ref, count, eps)
    o_ref[0] = jnp.maximum(y_ref[0] * scale + shift, 0.0).astype(o_ref.dtype)


def _bn_relu_add_kernel(y_ref, s_ref, q_ref, g_ref, be_ref, r_ref, o_ref,
                        *, count, eps):
    """BN + ReLU, then fused residual add (identity residual) + final ReLU."""
    scale, shift = _bn_scale_shift(s_ref, q_ref, g_ref, be_ref, count, eps)
    h = jnp.maximum(y_ref[0] * scale + shift, 0.0)
    r = r_ref[0].astype(jnp.float32)
    o_ref[0] = jnp.maximum(h + r, 0.0).astype(o_ref.dtype)


def _bn_relu_add_ds_kernel(y_ref, s_ref, q_ref, g_ref, be_ref,
                           xr_ref, wd_ref, bd_ref, o_ref,
                           *, count, eps, tile_l, valid_len, need_mask):
    """BN + ReLU, fused 1x1 downsample residual (+ zero-pad mask), add, ReLU."""
    scale, shift = _bn_scale_shift(s_ref, q_ref, g_ref, be_ref, count, eps)
    h = jnp.maximum(y_ref[0] * scale + shift, 0.0)               # relu2(bn2(conv2))
    r = jnp.dot(wd_ref[...], xr_ref[0],
                preferred_element_type=jnp.float32) + bd_ref[...]
    if need_mask:
        # Positions past the original input length must be exactly zero
        # (torch zero-pads the residual AFTER the downsample conv, so the bias
        # must not leak into the padded region).
        col = pl.program_id(1) * tile_l + jax.lax.broadcasted_iota(
            jnp.int32, r.shape, 1)
        r = jnp.where(col < valid_len, r, 0.0)
    o_ref[0] = jnp.maximum(h + r, 0.0).astype(o_ref.dtype)


# ----------------------------------------------------------------------------
# pallas_call wrappers
# ----------------------------------------------------------------------------
def _pick_l_tile(l, max_tile):
    # Full-extent block for short sequences, otherwise a 128-multiple tile
    # (ragged last tile handled by Pallas masking).
    return l if l <= max_tile else max_tile


def _conv_bias_stats(x_pad, w_kio, b, *, ksize, stride, dilation):
    """Conv1d + bias over all batches (grid over N) + per-channel sum/sumsq."""
    n, c_in, l_pad = x_pad.shape
    _, c_out, _ = w_kio.shape
    l_out = (l_pad - dilation * (ksize - 1) - 1) // stride + 1
    kernel = functools.partial(_conv_stats_kernel, ksize=ksize, stride=stride,
                               dilation=dilation, l_out=l_out)
    # TODO(synk): for very long L, add halo-based L tiling of the conv input.
    y, s, q = pl.pallas_call(
        kernel,
        grid=(n,),
        in_specs=[
            pl.BlockSpec((1, c_in, l_pad), lambda i: (i, 0, 0)),
            pl.BlockSpec((ksize, c_out, c_in), lambda i: (0, 0, 0)),
            pl.BlockSpec((c_out, 1), lambda i: (0, 0)),
        ],
        out_specs=[
            pl.BlockSpec((1, c_out, l_out), lambda i: (i, 0, 0)),
            pl.BlockSpec((c_out, 1), lambda i: (0, 0)),
            pl.BlockSpec((c_out, 1), lambda i: (0, 0)),
        ],
        out_shape=[
            jax.ShapeDtypeStruct((n, c_out, l_out), jnp.float32),
            jax.ShapeDtypeStruct((c_out, 1), jnp.float32),
            jax.ShapeDtypeStruct((c_out, 1), jnp.float32),
        ],
        compiler_params=pltpu.CompilerParams(
            dimension_semantics=("arbitrary",)),   # stats accumulate over batch
    )(x_pad, w_kio, b)
    return y, s, q


def _per_channel(v, c):
    return v.reshape(c, 1).astype(jnp.float32)


def _bn_relu(y, s, q, gamma, beta, *, eps, count, out_dtype, l_tile):
    n, c, l = y.shape
    tl = _pick_l_tile(l, l_tile)
    grid = (n, pl.cdiv(l, tl))
    kernel = functools.partial(_bn_relu_kernel, count=float(count), eps=eps)
    return pl.pallas_call(
        kernel,
        grid=grid,
        in_specs=[
            pl.BlockSpec((1, c, tl), lambda i, j: (i, 0, j)),
            pl.BlockSpec((c, 1), lambda i, j: (0, 0)),
            pl.BlockSpec((c, 1), lambda i, j: (0, 0)),
            pl.BlockSpec((c, 1), lambda i, j: (0, 0)),
            pl.BlockSpec((c, 1), lambda i, j: (0, 0)),
        ],
        out_specs=pl.BlockSpec((1, c, tl), lambda i, j: (i, 0, j)),
        out_shape=jax.ShapeDtypeStruct((n, c, l), out_dtype),
        compiler_params=pltpu.CompilerParams(
            dimension_semantics=("parallel", "parallel")),
    )(y, s, q, _per_channel(gamma, c), _per_channel(beta, c))


def _bn_relu_add(y, s, q, gamma, beta, resid, *, eps, count, out_dtype, l_tile):
    n, c, l = y.shape
    tl = _pick_l_tile(l, l_tile)
    grid = (n, pl.cdiv(l, tl))
    kernel = functools.partial(_bn_relu_add_kernel, count=float(count), eps=eps)
    return pl.pallas_call(
        kernel,
        grid=grid,
        in_specs=[
            pl.BlockSpec((1, c, tl), lambda i, j: (i, 0, j)),
            pl.BlockSpec((c, 1), lambda i, j: (0, 0)),
            pl.BlockSpec((c, 1), lambda i, j: (0, 0)),
            pl.BlockSpec((c, 1), lambda i, j: (0, 0)),
            pl.BlockSpec((c, 1), lambda i, j: (0, 0)),
            pl.BlockSpec((1, c, tl), lambda i, j: (i, 0, j)),
        ],
        out_specs=pl.BlockSpec((1, c, tl), lambda i, j: (i, 0, j)),
        out_shape=jax.ShapeDtypeStruct((n, c, l), out_dtype),
        compiler_params=pltpu.CompilerParams(
            dimension_semantics=("parallel", "parallel")),
    )(y, s, q, _per_channel(gamma, c), _per_channel(beta, c), resid)


def _bn_relu_add_downsample(y, s, q, gamma, beta, xr, wd, bd, *,
                            eps, count, valid_len, out_dtype, l_tile):
    n, c, l = y.shape
    c_in = xr.shape[1]
    tl = _pick_l_tile(l, l_tile)
    grid = (n, pl.cdiv(l, tl))
    kernel = functools.partial(_bn_relu_add_ds_kernel, count=float(count), eps=eps,
                               tile_l=tl, valid_len=valid_len,
                               need_mask=(valid_len < l))
    return pl.pallas_call(
        kernel,
        grid=grid,
        in_specs=[
            pl.BlockSpec((1, c, tl), lambda i, j: (i, 0, j)),      # y2 (pre-BN)
            pl.BlockSpec((c, 1), lambda i, j: (0, 0)),             # sum
            pl.BlockSpec((c, 1), lambda i, j: (0, 0)),             # sumsq
            pl.BlockSpec((c, 1), lambda i, j: (0, 0)),             # gamma
            pl.BlockSpec((c, 1), lambda i, j: (0, 0)),             # beta
            pl.BlockSpec((1, c_in, tl), lambda i, j: (i, 0, j)),   # residual x
            pl.BlockSpec((c, c_in), lambda i, j: (0, 0)),          # downsample W
            pl.BlockSpec((c, 1), lambda i, j: (0, 0)),             # downsample b
        ],
        out_specs=pl.BlockSpec((1, c, tl), lambda i, j: (i, 0, j)),
        out_shape=jax.ShapeDtypeStruct((n, c, l), out_dtype),
        compiler_params=pltpu.CompilerParams(
            dimension_semantics=("parallel", "parallel")),
    )(y, s, q, _per_channel(gamma, c), _per_channel(beta, c), xr, wd, bd)


# ----------------------------------------------------------------------------
# TemporalBlock forward
# ----------------------------------------------------------------------------
def temporal_block(x, params, *, stride, dilation, padding, eps=1e-5, l_tile=2048):
    n, c_in, l_in = x.shape
    w1 = params["w1"]
    c_out, _, k = w1.shape
    out_dtype = x.dtype

    def _w_slab(w):
        # (C_out, C_in, K) -> (K, C_out, C_in), bf16 for the native MXU path.
        return jnp.transpose(w, (2, 0, 1)).astype(jnp.bfloat16)

    # ---- stage 1: conv1 + bias (+ batch stats), then bn1 + relu1 ----
    x1p = jnp.pad(x, ((0, 0), (0, 0), (padding, padding))).astype(jnp.bfloat16)
    y1, s1, q1 = _conv_bias_stats(x1p, _w_slab(w1), _per_channel(params["b1"], c_out),
                                  ksize=k, stride=stride, dilation=dilation)
    l1 = y1.shape[2]
    h1 = _bn_relu(y1, s1, q1, params["g1"], params["be1"],
                  eps=eps, count=n * l1, out_dtype=jnp.bfloat16, l_tile=l_tile)

    # ---- stage 2: conv2 + bias (+ batch stats) ----
    h1p = jnp.pad(h1, ((0, 0), (0, 0), (padding, padding)))
    y2, s2, q2 = _conv_bias_stats(h1p, _w_slab(params["w2"]),
                                  _per_channel(params["b2"], c_out),
                                  ksize=k, stride=stride, dilation=dilation)
    l2 = y2.shape[2]

    # ---- residual crop / zero-pad to l2, fused bn2+relu2+add+relu epilogue ----
    if l2 <= l_in:
        xr = x[:, :, :l2]
    else:
        xr = jnp.pad(x, ((0, 0), (0, 0), (0, l2 - l_in)))

    if "wd" in params:            # in_channels != out_channels -> 1x1 downsample
        return _bn_relu_add_downsample(
            y2, s2, q2, params["g2"], params["be2"],
            xr.astype(jnp.bfloat16),
            params["wd"][:, :, 0].astype(jnp.bfloat16),
            _per_channel(params["bd"], c_out),
            eps=eps, count=n * l2, valid_len=min(l_in, l2),
            out_dtype=out_dtype, l_tile=l_tile)
    return _bn_relu_add(y2, s2, q2, params["g2"], params["be2"], xr,
                        eps=eps, count=n * l2, out_dtype=out_dtype, l_tile=l_tile)


# ----------------------------------------------------------------------------
# Pure-JAX reference (f32, HIGHEST precision) for correctness check only
# ----------------------------------------------------------------------------
def _conv1d_ref(x, w, b, stride, padding, dilation):
    y = jax.lax.conv_general_dilated(
        x, w, window_strides=(stride,), padding=[(padding, padding)],
        rhs_dilation=(dilation,), dimension_numbers=("NCH", "OIH", "NCH"),
        precision=jax.lax.Precision.HIGHEST)
    return y + b[None, :, None]


def _bn_relu_ref(y, gamma, beta, eps=1e-5):
    mean = y.mean(axis=(0, 2), keepdims=True)
    var = ((y - mean) ** 2).mean(axis=(0, 2), keepdims=True)
    yn = (y - mean) / jnp.sqrt(var + eps)
    return jnp.maximum(gamma[None, :, None] * yn + beta[None, :, None], 0.0)


def temporal_block_ref(x, params, *, stride, dilation, padding):
    out = _bn_relu_ref(_conv1d_ref(x, params["w1"], params["b1"], stride, padding, dilation),
                       params["g1"], params["be1"])
    out = _bn_relu_ref(_conv1d_ref(out, params["w2"], params["b2"], stride, padding, dilation),
                       params["g2"], params["be2"])
    residual = x
    if "wd" in params:
        residual = _conv1d_ref(x, params["wd"], params["bd"], 1, 0, 1)
    l_out, l_res = out.shape[2], residual.shape[2]
    if l_out < l_res:
        residual = residual[:, :, :l_out]
    elif l_out > l_res:
        residual = jnp.pad(residual, ((0, 0), (0, 0), (0, l_out - l_res)))
    return jnp.maximum(out + residual, 0.0)


# ----------------------------------------------------------------------------
if __name__ == "__main__":
    def make_params(key, c_in, c_out, k):
        ks = jax.random.split(key, 11)
        p = {
            "w1": 0.3 * jax.random.normal(ks[0], (c_out, c_in, k), jnp.float32),
            "b1": 0.1 * jax.random.normal(ks[1], (c_out,), jnp.float32),
            "g1": 1.0 + 0.1 * jax.random.normal(ks[2], (c_out,), jnp.float32),
            "be1": 0.1 * jax.random.normal(ks[3], (c_out,), jnp.float32),
            "w2": 0.3 * jax.random.normal(ks[4], (c_out, c_out, k), jnp.float32),
            "b2": 0.1 * jax.random.normal(ks[5], (c_out,), jnp.float32),
            "g2": 1.0 + 0.1 * jax.random.normal(ks[6], (c_out,), jnp.float32),
            "be2": 0.1 * jax.random.normal(ks[7], (c_out,), jnp.float32),
        }
        if c_in != c_out:   # downsample (1x1 conv)
            p["wd"] = 0.3 * jax.random.normal(ks[8], (c_out, c_in, 1), jnp.float32)
            p["bd"] = 0.1 * jax.random.normal(ks[9], (c_out,), jnp.float32)
        return p

    configs = [
        # downsample + zero-padded residual (out longer than input)
        dict(n=2, c_in=4, c_out=8, l=16, k=3, stride=1, dilation=2, padding=4, l_tile=2048),
        # identity residual + crop (out shorter than input)
        dict(n=2, c_in=8, c_out=8, l=16, k=3, stride=1, dilation=1, padding=0, l_tile=2048),
        # longer L exercising the L-tiled (ragged) epilogue grid + fused downsample mask
        dict(n=3, c_in=4, c_out=8, l=260, k=2, stride=1, dilation=1, padding=1, l_tile=128),
    ]

    key = jax.random.PRNGKey(0)
    for idx, cfg in enumerate(configs):
        key, xk, pk = jax.random.split(key, 3)
        x = jax.random.normal(xk, (cfg["n"], cfg["c_in"], cfg["l"]), jnp.float32)
        params = make_params(pk, cfg["c_in"], cfg["c_out"], cfg["k"])

        out = temporal_block(x, params, stride=cfg["stride"], dilation=cfg["dilation"],
                             padding=cfg["padding"], l_tile=cfg["l_tile"])
        out = jax.block_until_ready(out)

        ref = temporal_block_ref(x, params, stride=cfg["stride"],
                                 dilation=cfg["dilation"], padding=cfg["padding"])
        ref = jax.block_until_ready(ref)

        assert out.shape == ref.shape, (idx, out.shape, ref.shape)
        max_err = float(jnp.max(jnp.abs(out.astype(jnp.float32) - ref)))
        # Kernel uses native bf16 MXU matmuls + a bf16 intermediate activation;
        # the reference is f32 HIGHEST, so allow a bf16-scale tolerance.
        assert jnp.allclose(out, ref, rtol=1e-1, atol=1e-1), (idx, max_err)

    print("KERNEL_OK")
</pallas_src>

<mosaic_0001>
module attributes {stable_mosaic.version = 11 : i64} {
  func.func @_conv_stats_kernel(%arg0: i32, %arg1: memref<1x4x24xbf16, #tpu.memory_space<vmem>>, %arg2: memref<3x8x4xbf16, #tpu.memory_space<vmem>>, %arg3: memref<8x1xf32, #tpu.memory_space<vmem>>, %arg4: memref<1x8x20xf32, #tpu.memory_space<vmem>>, %arg5: memref<8x1xf32, #tpu.memory_space<vmem>>, %arg6: memref<8x1xf32, #tpu.memory_space<vmem>>) attributes {dimension_semantics = [#tpu.dimension_semantics<arbitrary>], iteration_bounds = array<i64: 2>, scalar_prefetch = 0 : i64, scratch_operands = 0 : i64, tpu.core_type = #tpu.core_type<tc>, window_params = [{transform_indices = @transform_0, window_bounds = array<i64: 1, 4, 24>}, {pipeline_mode = #tpu.pipeline_mode<synchronous>, transform_indices = @transform_1, window_bounds = array<i64: 3, 8, 4>}, {pipeline_mode = #tpu.pipeline_mode<synchronous>, transform_indices = @transform_2, window_bounds = array<i64: 8, 1>}, {transform_indices = @transform_3, window_bounds = array<i64: 1, 8, 20>}, {pipeline_mode = #tpu.pipeline_mode<synchronous>, transform_indices = @transform_4, window_bounds = array<i64: 8, 1>}, {pipeline_mode = #tpu.pipeline_mode<synchronous>, transform_indices = @transform_5, window_bounds = array<i64: 8, 1>}]} {
    %c0_i32 = arith.constant 0 : i32
    %0 = arith.cmpi eq, %arg0, %c0_i32 : i32
    %1 = arith.extui %0 : i1 to i32
    %c0_i32_0 = arith.constant 0 : i32
    %2 = arith.cmpi ne, %1, %c0_i32_0 : i32
    scf.if %2 {
      %cst_28 = arith.constant 0.000000e+00 : f32
      %38 = vector.broadcast %cst_28 : f32 to vector<8x1xf32>
      %c0_29 = arith.constant 0 : index
      %c0_30 = arith.constant 0 : index
      %39 = vector.load %arg5[%c0_29, %c0_30] : memref<8x1xf32, #tpu.memory_space<vmem>>, vector<8x1xf32>
      tpu.vector_store %arg5[%c0_29, %c0_30], %38 {strides = array<i32>} : memref<8x1xf32, #tpu.memory_space<vmem>>, vector<8x1xf32>,
      %cst_31 = arith.constant 0.000000e+00 : f32
      %40 = vector.broadcast %cst_31 : f32 to vector<8x1xf32>
      %c0_32 = arith.constant 0 : index
      %c0_33 = arith.constant 0 : index
      %41 = vector.load %arg6[%c0_32, %c0_33] : memref<8x1xf32, #tpu.memory_space<vmem>>, vector<8x1xf32>
      tpu.vector_store %arg6[%c0_32, %c0_33], %40 {strides = array<i32>} : memref<8x1xf32, #tpu.memory_space<vmem>>, vector<8x1xf32>,
    } else {
    }
    %c0 = arith.constant 0 : index
    %c0_1 = arith.constant 0 : index
    %c0_2 = arith.constant 0 : index
    %3 = vector.load %arg1[%c0, %c0_1, %c0_2] : memref<1x4x24xbf16, #tpu.memory_space<vmem>>, vector<1x4x24xbf16>
    %4 = vector.shape_cast %3 : vector<1x4x24xbf16> to vector<4x24xbf16>
    %cst = arith.constant 0.000000e+00 : f32
    %5 = vector.broadcast %cst : f32 to vector<8x20xf32>
    %6 = vector.extract_strided_slice %4 {offsets = [0, 0], sizes = [4, 20], strides = [1, 1]} : vector<4x24xbf16> to vector<4x20xbf16>
    %c0_3 = arith.constant 0 : index
    %c0_4 = arith.constant 0 : index
    %c0_5 = arith.constant 0 : index
    %7 = vector.load %arg2[%c0_3, %c0_4, %c0_5] : memref<3x8x4xbf16, #tpu.memory_space<vmem>>, vector<1x8x4xbf16>
    %8 = vector.shape_cast %7 : vector<1x8x4xbf16> to vector<8x4xbf16>
    %cst_6 = arith.constant dense<0.000000e+00> : vector<8x20xf32>
    %9 = tpu.matmul %8, %6, %cst_6 {dimension_numbers = #tpu.dot_dimension_numbers<[1], [0], [0], [1], [0, 0, 1, 1], [], []>} : vector<8x4xbf16>, vector<4x20xbf16>, vector<8x20xf32> -> vector<8x20xf32>
    %10 = arith.addf %5, %9 : vector<8x20xf32>
    %11 = vector.extract_strided_slice %4 {offsets = [0, 2], sizes = [4, 20], strides = [1, 1]} : vector<4x24xbf16> to vector<4x20xbf16>
    %c1 = arith.constant 1 : index
    %c0_7 = arith.constant 0 : index
    %c0_8 = arith.constant 0 : index
    %12 = vector.load %arg2[%c1, %c0_7, %c0_8] : memref<3x8x4xbf16, #tpu.memory_space<vmem>>, vector<1x8x4xbf16>
    %13 = vector.shape_cast %12 : vector<1x8x4xbf16> to vector<8x4xbf16>
    %cst_9 = arith.constant dense<0.000000e+00> : vector<8x20xf32>
    %14 = tpu.matmul %13, %11, %cst_9 {dimension_numbers = #tpu.dot_dimension_numbers<[1], [0], [0], [1], [0, 0, 1, 1], [], []>} : vector<8x4xbf16>, vector<4x20xbf16>, vector<8x20xf32> -> vector<8x20xf32>
    %15 = arith.addf %10, %14 : vector<8x20xf32>
    %16 = vector.extract_strided_slice %4 {offsets = [0, 4], sizes = [4, 20], strides = [1, 1]} : vector<4x24xbf16> to vector<4x20xbf16>
    %c2 = arith.constant 2 : index
    %c0_10 = arith.constant 0 : index
    %c0_11 = arith.constant 0 : index
    %17 = vector.load %arg2[%c2, %c0_10, %c0_11] : memref<3x8x4xbf16, #tpu.memory_space<vmem>>, vector<1x8x4xbf16>
    %18 = vector.shape_cast %17 : vector<1x8x4xbf16> to vector<8x4xbf16>
    %cst_12 = arith.constant dense<0.000000e+00> : vector<8x20xf32>
    %19 = tpu.matmul %18, %16, %cst_12 {dimension_numbers = #tpu.dot_dimension_numbers<[1], [0], [0], [1], [0, 0, 1, 1], [], []>} : vector<8x4xbf16>, vector<4x20xbf16>, vector<8x20xf32> -> vector<8x20xf32>
    %20 = arith.addf %15, %19 : vector<8x20xf32>
    %c0_13 = arith.constant 0 : index
    %c0_14 = arith.constant 0 : index
    %21 = vector.load %arg3[%c0_13, %c0_14] : memref<8x1xf32, #tpu.memory_space<vmem>>, vector<8x1xf32>
    %22 = vector.broadcast %21 : vector<8x1xf32> to vector<8x20xf32>
    %23 = arith.addf %20, %22 : vector<8x20xf32>
    %c0_15 = arith.constant 0 : index
    %c0_16 = arith.constant 0 : index
    %c0_17 = arith.constant 0 : index
    %24 = vector.load %arg4[%c0_15, %c0_16, %c0_17] : memref<1x8x20xf32, #tpu.memory_space<vmem>>, vector<1x8x20xf32>
    %25 = vector.shape_cast %24 : vector<1x8x20xf32> to vector<8x20xf32>
    %26 = vector.shape_cast %23 : vector<8x20xf32> to vector<1x8x20xf32>
    tpu.vector_store %arg4[%c0_15, %c0_16, %c0_17], %26 {strides = array<i32>} : memref<1x8x20xf32, #tpu.memory_space<vmem>>, vector<1x8x20xf32>,
    %c0_18 = arith.constant 0 : index
    %c0_19 = arith.constant 0 : index
    %27 = vector.load %arg5[%c0_18, %c0_19] : memref<8x1xf32, #tpu.memory_space<vmem>>, vector<8x1xf32>
    %cst_20 = arith.constant dense<0.000000e+00> : vector<8xf32>
    %28 = vector.multi_reduction <add>, %23, %cst_20 [1] : vector<8x20xf32> to vector<8xf32>
    %29 = vector.shape_cast %28 : vector<8xf32> to vector<8x1xf32>
    %30 = arith.addf %27, %29 : vector<8x1xf32>
    %c0_21 = arith.constant 0 : index
    %c0_22 = arith.constant 0 : index
    %31 = vector.load %arg5[%c0_21, %c0_22] : memref<8x1xf32, #tpu.memory_space<vmem>>, vector<8x1xf32>
    tpu.vector_store %arg5[%c0_21, %c0_22], %30 {strides = array<i32>} : memref<8x1xf32, #tpu.memory_space<vmem>>, vector<8x1xf32>,
    %c0_23 = arith.constant 0 : index
    %c0_24 = arith.constant 0 : index
    %32 = vector.load %arg6[%c0_23, %c0_24] : memref<8x1xf32, #tpu.memory_space<vmem>>, vector<8x1xf32>
    %33 = arith.mulf %23, %23 : vector<8x20xf32>
    %cst_25 = arith.constant dense<0.000000e+00> : vector<8xf32>
    %34 = vector.multi_reduction <add>, %33, %cst_25 [1] : vector<8x20xf32> to vector<8xf32>
    %35 = vector.shape_cast %34 : vector<8xf32> to vector<8x1xf32>
    %36 = arith.addf %32, %35 : vector<8x1xf32>
    %c0_26 = arith.constant 0 : index
    %c0_27 = arith.constant 0 : index
    %37 = vector.load %arg6[%c0_26, %c0_27] : memref<8x1xf32, #tpu.memory_space<vmem>>, vector<8x1xf32>
    tpu.vector_store %arg6[%c0_26, %c0_27], %36 {strides = array<i32>} : memref<8x1xf32, #tpu.memory_space<vmem>>, vector<8x1xf32>,
    return
  }
  func.func @transform_0(%arg0: i32) -> (i32, i32, i32) {
    %c0_i32 = arith.constant 0 : i32
    %c0_i32_0 = arith.constant 0 : i32
    %c0_i32_1 = arith.constant 0 : i32
    return %arg0, %c0_i32, %c0_i32_0 : i32, i32, i32
  }
  func.func @transform_1(%arg0: i32) -> (i32, i32, i32) {
    %c0_i32 = arith.constant 0 : i32
    %c0_i32_0 = arith.constant 0 : i32
    %c0_i32_1 = arith.constant 0 : i32
    %c0_i32_2 = arith.constant 0 : i32
    return %c0_i32, %c0_i32_0, %c0_i32_1 : i32, i32, i32
  }
  func.func @transform_2(%arg0: i32) -> (i32, i32) {
    %c0_i32 = arith.constant 0 : i32
    %c0_i32_0 = arith.constant 0 : i32
    %c0_i32_1 = arith.constant 0 : i32
    return %c0_i32, %c0_i32_0 : i32, i32
  }
  func.func @transform_3(%arg0: i32) -> (i32, i32, i32) {
    %c0_i32 = arith.constant 0 : i32
    %c0_i32_0 = arith.constant 0 : i32
    %c0_i32_1 = arith.constant 0 : i32
    return %arg0, %c0_i32, %c0_i32_0 : i32, i32, i32
  }
  func.func @transform_4(%arg0: i32) -> (i32, i32) {
    %c0_i32 = arith.constant 0 : i32
    %c0_i32_0 = arith.constant 0 : i32
    %c0_i32_1 = arith.constant 0 : i32
    return %c0_i32, %c0_i32_0 : i32, i32
  }
  func.func @transform_5(%arg0: i32) -> (i32, i32) {
    %c0_i32 = arith.constant 0 : i32
    %c0_i32_0 = arith.constant 0 : i32
    %c0_i32_1 = arith.constant 0 : i32
    return %c0_i32, %c0_i32_0 : i32, i32
  }
}

</mosaic_0001>

<bundles_post_ra>
// kernel: tpu_custom_call.1
= control target key start
LH: loop header
LB: loop body
LE: loop exit
PB: predicated region body
PF: predicated region fallthrough
CT: control target
= control target key end

     0   :  { %11 = vsyncpa [#allocation3], 0  ;;  %s825_s0 = inlined_call_operand.vmem [shape: bf16[2,4,24], index: 0, kind: input, shape index: {}]   ;;  %s826_s1 = inlined_call_operand.vmem [shape: bf16[3,8,4], index: 1, kind: input, shape index: {}]   ;;  %s827_s2 = inlined_call_operand.vmem [shape: f32[8,1], index: 2, kind: input, shape index: {}]   ;;  %s828_s3 = inlined_call_operand.hbm [shape: f32[2,8,20], index: 3, kind: output, shape index: {0}]   ;;  %s829_s4 = inlined_call_operand.vmem [shape: f32[8,1], index: 4, kind: output, shape index: {1}]   ;;  %s830_s5 = inlined_call_operand.vmem [shape: f32[8,1], index: 5, kind: output, shape index: {2}]  }
   0x1   :  { %13 = vsyncpa [#allocation3 + $0x1], 0  ;;  %s680_s18 = smov 0   ;;  %s682_s19 = smov 0  }
   0x2   :  { %s684_s20 = smov 0   ;;  %s686_s21 = smov 0  }
   0x3 LB: > { %s701_s22 = sadd.s32 4294967295, %s640_s21   ;;  %s490_s23 = sadd.s32 4294967294, %s640_s21   ;;  %s640_s21 = sphi %s686_s21, %s836_s21   ;;  %s636_s20 = sphi %s684_s20, %s835_s20   ;;  %s632_s19 = sphi %s682_s19, %s834_s19   ;;  %s628_s18 = sphi %s680_s18, %s833_s18  }
   0x4   : > { %s705_s24 = sadd.s32 1, %s640_s21   ;;  %s94_s25 = sadd.s32 1, %s636_s20 }
   0x5   : > { %s91_s26 = ssub.s32 %s640_s21, %s705_s24  ;;  %p104_p0 = scmp.ne.s32.totalorder %s636_s20, %s632_s19 }
   0x6   : > { %p92_p1 = scmp.eq.s32.totalorder %s91_s26, 0  ;;  %p105_p2 = scmp.eq.s32.totalorder %s701_s22, 1 }
   0x7   : > { %p110_p3 = scmp.ne.s32.totalorder %s632_s19, %s628_s18  ;;  %p111_p4 = scmp.eq.s32.totalorder %s490_s23, 1 }
   0x8   : > { %s716_s27 = scalar_select %p92_p1, %s636_s20, %s94_s25  }
   0x9   : > { %p718_p5 = por %p105_p2, %p104_p0  ;;  %p722_p6 = por %p111_p4, %p110_p3 }
   0xa   : > { %p493_p7 = scmp.ge.s32.totalorder %s640_s21, 1  ;;  %p184_p8 = scmp.lt.s32.totalorder %s640_s21, 3 }
   0xc   : > { %p185_p9 = pnand %p493_p7, %p184_p8 }
   0xd   : > { %s204_s30 = sand.u32 (!%p185_p9), 1, %s632_s19   ;;  %p211_p10 = scmp.lt.s32.totalorder (!%p185_p9), %s701_s22, 1 }
   0xe   : > { %188 = sbr.rel (%p185_p9) target bundleno = 529 (0x211), region = 32  ;;  %s732_s6 = sshll.u32 (!%p185_p9), %s204_s30, 3 }
   0xf   : > { %s206_s12 = scalar_lea.vmem (!%p185_p9), [#allocation2], %s732_s6  ;;  %p496_p11 = scmp.ne.s32.totalorder (!%p185_p9), %s701_s22, 0 }
  0x15   : > { %s212_s7 = scalar_select %p211_p10, %s701_s22, 1 }
  0x16   : > { %219 = sbr.rel (%p496_p11) target bundleno = 29 (0x1d), region = 36  ;;  %vm220_vm0 = vcmask (!%p496_p11), 7168   ;;  %v642_v0 = vmov (!%p496_p11), 0.0  }
  0x17   : > { %s495_s8 = sshll.u32 %s212_s7, 1  ;;  %221 = vst.msk [vmem:[%s829_s4] sm:$0xff] (!%p496_p11), %vm220_vm0, %v642_v0  ;;  %222 = vst.msk [vmem:[%s830_s5] sm:$0xff] (!%p496_p11), %vm220_vm0, %v642_v0 }
  0x18   : > { %s214_s11 = scalar_lea.vmem %s825_s0, %s495_s8 }
  0x1d PF: > { %v231_v1 = vlaneseq  ;;  %v223_v2 = vld [vmem:[%s214_s11] sm:$0x3]  ;;  %v643_v3 = vmov 1983009808   ;;  %vm241_vm1 = vcmask 1041408   ;;  %v644_v6 = vmov 0.0  }
  0x1e   : > { %v229_v4 = vunpack.c.l.s4 %v643_v3  ;;  %512 = vmatprep.subr.bf16.mxu0 %v644_v6  ;;  %518 = vmatprep.subr.bf16.mxu1 %v644_v6  ;;  %v289_v7 = vsel %vm241_vm1, %v223_v2, 0  ;;  %vm645_vm2 = vmmov 0   ;;  %vm237_vm3 = vcmask 31744   ;;  %v224_v9 = vld [vmem:[%s826_s1] sm:$0xf]  ;;  %s646_s7 = smov 126  }
  0x1f   : > { %v232_v5 = vshrl.u32 %v231_v1, 7  ;;  %519 = vmatpush3.bf16.msra.mxu1 %v289_v7  ;;  %514 = vmatprep.mubr.msk.bf16.mxu0 %vm645_vm2, %v644_v6  ;;  %v382_v12 = vld [vmem:[%s827_s2] sm:$0xff]  ;;  %v647_v13 = vmov 0   ;;  %s648_s8 = smov 124   ;;  %v500_v19 = vld [vmem:[%s826_s1 + $0x8] sm:$0xf] }
  0x20   : > { %v230_v8 = vunpack.c.0.s8 %v229_v4  ;;  %520 = vmatprep.mubr.msk.bf16.mxu1 %vm645_vm2, %v644_v6  ;;  %576 = vset.pattern.permute.xlu1 %v647_v13  ;;  %v497_v16 = vld [vmem:[%s826_s1 + $0x4] sm:$0xf]  ;;  %vm389_vm4 = vcmask 162816   ;;  %s503_s14 = sshll.u32 %s701_s22, 7  ;;  %s419_s15 = sshll.u32 %s206_s12, 4  ;;  %s420_s15 = int_to_ptr.vmem [resolvable:$true] %s419_s15 }
  0x21   : > { %385 = vperm.xlu1 %576, %v382_v12   ;;  %577 = vset.pattern.permute.xlu0 %v647_v13  ;;  %s775_s23 = scalar_lea.hbm %s828_s3, %s503_s14  ;;  %s406_s25 = scalar_lea.sflag [#allocation3], %s204_s30 }
  0x22   : > { %v233_v10 = vsub.s32 %v230_v8, %v232_v5  ;;  %521 = vmatmul.mubr.msk.bf16.vlgmr.msra.gmra.mrb[0].mxu1 %vm237_vm3, %v224_v9  ;;  %s578_s26 = scalar_lea.vmem %s420_s15, 128 }
  0x23   : > { %p579_p12 = scmp.ne.s32.totalorder %s420_s15, %s578_s26 }
  0x24   : > { %v234_v11 = vrot.slane %v223_v2, %v233_v10 }
  0x25   : > { %p580_p13 = pnand %p579_p12, %p718_p5 }
  0x26   : > { %235 = vrot.lane.b32.xlu0 %v234_v11, %s646_s7  ;;  %s649_s7 = smov [#allocation2]  }
  0x27   : > { %p581_p0 = pneg %p580_p13 }
  0x2a   : > { %333 = vrot.lane.b32.xlu0 %v234_v11, %s648_s8  ;;  %s582_s8 = sshll.u32 %s649_s7, 4  ;;  %s583_s8 = int_to_ptr.vmem [resolvable:$false] %s582_s8 }
  0x2b   : > { %s584_s9 = scalar_lea.vmem %s583_s8, 256  ;;  %p585_p1 = scmp.lt.s32.totalorder %s420_s15, %s583_s8 }
  0x2c   : > { %p586_p2 = scmp.lt.s32.totalorder %s584_s9, %s578_s26 }
  0x2e   : > { %p587_p3 = por %p586_p2, %p585_p1 }
  0x30   : > { %p588_p4 = pnand %p587_p3, %p581_p0 }
  0x98   : > { %v236_v14 = vpop.permute.xlu0 %235 }
  0x99   : > { %v243_v15 = vsel %vm241_vm1, %v236_v14, 0 }
  0x9a   : > { %513 = vmatpush3.bf16.msra.mxu0 %v243_v15 }
  0x9b   : > { %524 = vmatprep.subr.bf16.mxu0 %v644_v6 }
  0x9c   : > { %v334_v17 = vpop.permute.xlu0 %333 }
  0x9d   : > { %v339_v18 = vsel %vm241_vm1, %v334_v17, 0  ;;  %515 = vmatmul.mubr.msk.bf16.vlgmr.msra.gmra.mrb[0].mxu0 %vm237_vm3, %v497_v16 }
  0x9e   : > { %525 = vmatpush3.bf16.msra.mxu0 %v339_v18  ;;  %526 = vmatprep.mubr.msk.bf16.mxu0 %vm645_vm2, %v644_v6 }
  0xa0   : > { %v386_v30 = vpop.permute.xlu1 %385 }
  0xa5   : > { %527 = vmatmul.mubr.msk.bf16.vlgmr.msra.gmra.mrb[4].mxu0 %vm237_vm3, %v500_v19 }
  0xf5   : > { %v325_v20 = vpop.f32.mrb[0].mxu1 }
  0xf6   : > { %v522_v21 = vpop.f32.mrb[1].mxu1 }
  0xf7   : > { %v328_v22 = vpop.f32.mrb[2].mxu1 }
  0xf8   : > { %v523_v23 = vpop.f32.mrb[3].mxu1 }
 0x170   : > { %v279_v24 = vpop.f32.mrb[0].mxu0 }
 0x171   : > { %v516_v25 = vpop.f32.mrb[1].mxu0  ;;  %v326_v26 = vadd.f32 %v325_v20, %v279_v24 }
 0x172   : > { %v282_v27 = vpop.f32.mrb[2].mxu0 }
 0x173   : > { %v517_v28 = vpop.f32.mrb[3].mxu0 }
 0x178   : > { %v375_v29 = vpop.f32.mrb[4].mxu0 }
 0x179   : > { %v381_v31 = vadd.f32 %v375_v29, %v326_v26  ;;  %v528_v32 = vpop.f32.mrb[5].mxu0 }
 0x17a   : > { %v378_v33 = vpop.f32.mrb[6].mxu0 }
 0x17b   : > { %v388_v34 = vadd.f32 %v386_v30, %v381_v31  ;;  %v529_v35 = vpop.f32.mrb[7].mxu0 }
 0x17d   : > { %v392_v36 = vsel %vm389_vm4, %v388_v34, 0.0  ;;  %390 = vst.msk [vmem:[%s206_s12] sm:$0xff] %vm389_vm4, %v388_v34  ;;  %v399_v37 = vmul.f32 %v388_v34, %v388_v34 }
 0x17e   : > { %393 = vadd.xlane.f32.xlu1 %v392_v36 }
 0x17f   : > { %v400_v38 = vsel %vm389_vm4, %v399_v37, 0.0 }
 0x180   : > { %401 = vadd.xlane.f32.xlu0 %v400_v38 }
 0x181   : > { %591 = shalt.err (!%p588_p4)
}
 0x182   : > { %s592_s22 = scalar_lea.hbm %s775_s23, 128  ;;  %s596_s12 = scalar_lea.hbm %s828_s3, 256 }
 0x183   : > { %p593_p7 = scmp.ne.s32.totalorder %s775_s23, %s592_s22  ;;  %p597_p10 = scmp.lt.u32.totalorder %s775_s23, %s828_s3 }
 0x184   : > { %p598_p11 = scmp.lt.u32.totalorder %s596_s12, %s592_s22  ;;  %p600_p13 = scmp.lt.u32.totalorder %s592_s22, %s775_s23 }
 0x185   : > { %p594_p8 = pnand %p593_p7, %p718_p5 }
 0x186   : > { %p599_p12 = por %p598_p11, %p597_p10 }
 0x187   : > { %p595_p9 = pneg %p594_p8 }
 0x188   : > { %p601_p0 = por %p600_p13, %p599_p12 }
 0x18a   : > { %p602_p1 = pnand %p601_p0, %p595_p9 }
 0x18c   : > { %605 = shalt.err (!%p602_p1)
}
 0x18d   : > { %530 = dma.vmem_to_hbm [thread:$0]  (%p718_p5), %s420_s15, 128, %s775_s23, %s406_s25   ;;  %v391_v39 = vld [vmem:[%s829_s4] sm:$0xff]  ;;  %vm396_vm5 = vcmask 7168  }
 0x18e   : > { %v398_v41 = vld [vmem:[%s830_s5] sm:$0xff] }
 0x20b   : > { %v394_v40 = vpop.xlane.xlu1 %393 }
 0x20c   : > { %v395_v42 = vadd.f32 %v394_v40, %v391_v39 }
 0x20d   : > { %v402_v43 = vpop.xlane.xlu0 %401 }
 0x20e   : > { %397 = vst.msk [vmem:[%s829_s4] sm:$0xff] %vm396_vm5, %v395_v42  ;;  %v403_v44 = vadd.f32 %v402_v43, %v398_v41 }
 0x210   : > { %404 = vst.msk [vmem:[%s830_s5] sm:$0xff] %vm396_vm5, %v403_v44 }
 0x211 PF: > { %p536_p5 = scmp.ge.s32.totalorder %s640_s21, 2  ;;  %s443_s15 = sand.u32 1, %s628_s18  }
 0x212   : > { %s444_s23 = scalar_lea.sflag [#allocation3], %s443_s15 }
 0x213   : > { %p533_p2 = pnand %p536_p5, %p722_p6 }
 0x215   : > { %623 = dma.done.wait (!%p533_p2), %s444_s23, 128  }
 0x216   : > { %625 = vsyncadd (!%p533_p2), %s444_s23, 4294967168  ;;  %p16_p3 = scmp.ge.s32.totalorder %s705_s24, 4   ;;  %s833_s18 = smov %s632_s19 }
 0x217   : > { %s834_s19 = smov %s636_s20  ;;  %s835_s20 = smov %s716_s27 }
 0x218   : > { %s836_s21 = smov %s705_s24  ;;  %18 = sbr.rel (!%p16_p3) target bundleno = 3 (0x3), region = 89 }
 0x21f   :  { %449 = vsyncpa [#allocation3], 1 }
 0x220   :  { %451 = vsyncpa [#allocation3 + $0x1], 1 }

</bundles_post_ra>
